<compile_context>
chip_gen: v7x
topology: tpu7x:2x2x1
jax: 0.10.0
libtpu: 0.0.40
codegen_flags: <defaults>
</compile_context>

<pallas_src>
import functools

import jax
import jax.numpy as jnp
from jax.experimental import pallas as pl
from jax.experimental.pallas import tpu as pltpu


_TARGET_BYTES = 4 << 20        # ~4 MiB of blocks per grid step
_VMEM_LIMIT_BYTES = 32 << 20   # raises v5e's 16 MiB scoped default, safe on v7x (64 MiB phys)


def _ceil_to(x, m):
    return ((x + m - 1) // m) * m


def _pick_rows(n_rows, bytes_per_row, target_bytes, min_blocks=4, multiple=1):
    """Rows (batch images) per grid step.

    Targets ~target_bytes per step, caps the tile so the grid has >= min_blocks
    steps when possible (v7x megacore + pipelining), and rounds to a sublane
    multiple when the row axis is the second-to-last block dim (unless the
    block covers the full axis).  Works for any n_rows via cdiv grids plus
    in-kernel masking.
    """
    bt = max(1, min(n_rows, target_bytes // max(bytes_per_row, 1)))
    mb = min(n_rows, min_blocks)
    if mb > 1:
        bt = min(bt, pl.cdiv(n_rows, mb))
    if bt >= n_rows:
        return n_rows
    if multiple > 1:
        bt = min(max(multiple, (bt // multiple) * multiple), n_rows)
    return bt


def _reflect_fold_weights(n, k, s, p):
    """Per-source-pixel multiplicity along one axis.

    How many times original index t appears in the unfolded tensor built from
    (k, stride s) windows of the length-(n + 2p) reflect-padded axis.  Folding
    reflect pad + window overlap into this static weight lets the global
    nonzero sum/count be computed from the UNPADDED input in a single pass.
    """
    npad = n + 2 * p
    nwin = (npad - k) // s + 1
    mult = [0] * npad
    for r in range(nwin):
        for a in range(r * s, r * s + k):
            mult[a] += 1
    w = [0.0] * n
    for a in range(npad):
        t = a - p
        if t < 0:                      # jnp.pad / torch 'reflect' (no edge repeat)
            t = -t
        elif t > n - 1:
            t = 2 * (n - 1) - t
        w[t] += float(mult[a])
    return w


# ----------------------------- Pass 1: global stats -------------------------
def _stats_kernel(x_ref, w_ref, stat_ref, *, total_rows, block_rows):
    """Per-block partial (nonzero sum, nonzero count) of the unfolded tensor.

    x_ref:    (bt, ...) block of the UNPADDED input (lane-dense (bt, H*W) slab
              when it fits the budget, otherwise (bt, H, W)).
    w_ref:    (1, ...) static reflect/overlap multiplicity weights.
    stat_ref: (1, 8, 128) -- lane 0: partial nonzero sum, lane 1: partial count.
    Ragged cdiv blocks are masked with a batch-row iota so garbage rows never
    contaminate the global statistics.
    """
    x = x_ref[...]
    wt = w_ref[...]                                      # broadcasts over batch rows
    row = jax.lax.broadcasted_iota(jnp.int32, x.shape, 0) + pl.program_id(0) * block_rows
    valid = row < total_rows
    psum = jnp.sum(jnp.where(valid, x, 0.0) * wt)        # zeros contribute 0 anyway
    pcnt = jnp.sum(jnp.where(valid & (x != 0.0), wt, 0.0))
    lane = jax.lax.broadcasted_iota(jnp.int32, stat_ref.shape, 2)
    stat_ref[...] = jnp.where(lane == 0, psum, 0.0) + jnp.where(lane == 1, pcnt, 0.0)


# ----------------------------- Pass 2: pooled output ------------------------
def _pool_kernel(fill_ref, xp_ref, o_ref, *, kh, kw, ohd, owd):
    """Dense (stride-1) masked average pooling with in-register tap recompute.

    xp_ref: (bt, Hp, Wp) reflect-padded block.  The K = kh*kw window taps are
    static unstrided slices of the VMEM tile; no unfolded tensor or s/z
    intermediates ever hit HBM.  `fill` is the global nonzero mean (SMEM).
    Output = (window_sum + zero_count * fill) / K.
    """
    fill = fill_ref[0]
    k_total = float(kh * kw)
    inv_k = 1.0 / k_total
    ws = None      # per-window sum (zeros contribute 0 => nonzero sum)
    nzc = None     # per-window nonzero count
    for i in range(kh):
        for j in range(kw):
            v = xp_ref[:, pl.ds(i, ohd), pl.ds(j, owd)]
            nz = (v != 0.0).astype(jnp.float32)
            ws = v if ws is None else ws + v
            nzc = nz if nzc is None else nzc + nz
    o_ref[...] = (ws + (k_total - nzc) * fill) * inv_k


def mask_avg_pool2d(x, kernel_size, stride, padding=0):
    """x: (N, C, H, W) (or (H, W)). Returns pooled array (squeeze(0) like PyTorch)."""
    kh, kw = (kernel_size, kernel_size) if isinstance(kernel_size, int) else tuple(kernel_size)
    sh, sw = (stride, stride) if isinstance(stride, int) else tuple(stride)
    del padding  # the PyTorch module stores it but never uses it in forward

    if x.ndim != 4:
        x = x.reshape(1, 1, x.shape[-2], x.shape[-1])
    n, c, h, w = x.shape
    pad = (kh - 1) // 2

    xb = x.reshape(n * c, h, w).astype(jnp.float32)
    b = n * c
    hw = h * w

    # ---- Pass 1: global nonzero sum / count of the unfolded tensor ----------
    rw = jnp.asarray(_reflect_fold_weights(h, kh, sh, pad), dtype=jnp.float32)
    cw = jnp.asarray(_reflect_fold_weights(w, kw, sw, pad), dtype=jnp.float32)
    w2d = rw[:, None] * cw[None, :]                      # (h, w), small exact integers

    flatten = (8 * hw * 4) <= (2 * _TARGET_BYTES)        # 8-row slab fits the budget
    if flatten:
        x1 = xb.reshape(b, hw)                           # free: contiguous reshape
        w1 = w2d.reshape(1, hw)
        bt1 = _pick_rows(b, hw * 4, _TARGET_BYTES, multiple=8)
        in_specs1 = [pl.BlockSpec((bt1, hw), lambda i: (i, 0)),
                     pl.BlockSpec((1, hw), lambda i: (0, 0))]
    else:
        x1 = xb
        w1 = w2d.reshape(1, h, w)
        bt1 = _pick_rows(b, hw * 4, _TARGET_BYTES)
        in_specs1 = [pl.BlockSpec((bt1, h, w), lambda i: (i, 0, 0)),
                     pl.BlockSpec((1, h, w), lambda i: (0, 0, 0))]
    nb1 = pl.cdiv(b, bt1)

    stats = pl.pallas_call(
        functools.partial(_stats_kernel, total_rows=b, block_rows=bt1),
        out_shape=jax.ShapeDtypeStruct((nb1, 8, 128), jnp.float32),
        grid=(nb1,),
        in_specs=in_specs1,
        out_specs=pl.BlockSpec((1, 8, 128), lambda i: (i, 0, 0)),
        compiler_params=pltpu.CompilerParams(
            dimension_semantics=("parallel",),
            vmem_limit_bytes=_VMEM_LIMIT_BYTES),
    )(x1, w1)

    # Two-level reduction: per-block partials in-kernel, tiny final sum here.
    nz_sum = jnp.sum(stats[:, 0, 0])
    nz_cnt = jnp.sum(stats[:, 0, 1])
    # Guard the all-zero case: degrade to plain average pooling instead of NaN.
    # TODO(synk): the PyTorch NaN branch (all-zero input -> extra mean over the
    # last axis, which changes the output rank) is a data-dependent shape change
    # with no static-shape JAX equivalent and is not reproduced.
    fill = jnp.where(nz_cnt > 0, nz_sum / jnp.maximum(nz_cnt, 1.0), 0.0)
    fill = fill.astype(jnp.float32).reshape(1)

    # ---- Pass 2: fused pooling with in-kernel tap recompute ------------------
    # TODO(synk): fold the reflect pad into this pass (mirrored row/col stores
    # into a VMEM scratch) to drop this extra HBM read+write; it needs unaligned
    # sub-window VMEM stores that could not be validated here.
    xp = jnp.pad(xb, ((0, 0), (pad, pad), (pad, pad)), mode="reflect")
    hp, wp = h + 2 * pad, w + 2 * pad
    ohd, owd = hp - kh + 1, wp - kw + 1                  # dense (stride-1) output dims
    oh = (hp - kh) // sh + 1
    ow = (wp - kw) // sw + 1

    img_bytes = (_ceil_to(hp, 8) * _ceil_to(wp, 128)
                 + _ceil_to(ohd, 8) * _ceil_to(owd, 128)) * 4
    bt2 = _pick_rows(b, img_bytes, _TARGET_BYTES)
    nb2 = pl.cdiv(b, bt2)
    # TODO(synk): for very large single images (b == 1) add a second grid axis
    # over output rows (overlapping row windows) so the block is not the whole image.

    out_dense = pl.pallas_call(
        functools.partial(_pool_kernel, kh=kh, kw=kw, ohd=ohd, owd=owd),
        out_shape=jax.ShapeDtypeStruct((b, ohd, owd), jnp.float32),
        grid=(nb2,),
        in_specs=[
            pl.BlockSpec(memory_space=pltpu.MemorySpace.SMEM),   # flat (1,) fill scalar
            pl.BlockSpec((bt2, hp, wp), lambda i: (i, 0, 0)),
        ],
        out_specs=pl.BlockSpec((bt2, ohd, owd), lambda i: (i, 0, 0)),
        compiler_params=pltpu.CompilerParams(
            dimension_semantics=("parallel",),
            vmem_limit_bytes=_VMEM_LIMIT_BYTES),
    )(fill, xp)

    # Strided windows are a subset of the dense ones => exact wrapper subsample.
    out = out_dense if (sh == 1 and sw == 1) else out_dense[:, ::sh, ::sw][:, :oh, :ow]

    pooled = out.reshape(n, c, oh, ow)
    return jnp.squeeze(pooled, axis=0) if n == 1 else pooled


def _reference(x, kh, kw, sh, sw):
    """Pure-JAX reference matching the PyTorch forward (modulo NaN branch)."""
    n, c, h, w = x.shape
    pad = (kh - 1) // 2
    xp = jnp.pad(x.astype(jnp.float32), ((0, 0), (0, 0), (pad, pad), (pad, pad)),
                 mode="reflect")
    oh = (xp.shape[2] - kh) // sh + 1
    ow = (xp.shape[3] - kw) // sw + 1
    wins = [xp[:, :, i:i + sh * (oh - 1) + 1:sh, j:j + sw * (ow - 1) + 1:sw]
            for i in range(kh) for j in range(kw)]
    u = jnp.stack(wins, axis=-1)                         # (n, c, oh, ow, K)
    nz = u != 0
    fill = jnp.sum(jnp.where(nz, u, 0.0)) / jnp.maximum(jnp.sum(nz), 1)
    m = jnp.where(nz, u, fill).mean(-1)
    return jnp.squeeze(m, axis=0) if n == 1 else m


if __name__ == "__main__":
    key = jax.random.PRNGKey(0)
    x = jax.random.uniform(key, (2, 4, 16, 16), dtype=jnp.float32)
    # inject exact zeros to emulate missing data
    zmask = jax.random.bernoulli(jax.random.PRNGKey(1), 0.2, x.shape)
    x = jnp.where(zmask, 0.0, x)

    out = mask_avg_pool2d(x, kernel_size=3, stride=1, padding=1)
    out = jax.block_until_ready(out)
    assert out.shape == (2, 4, 16, 16), out.shape
    assert bool(jnp.all(jnp.isfinite(out)))

    ref = jax.block_until_ready(_reference(x, 3, 3, 1, 1))
    assert bool(jnp.allclose(out, ref, rtol=1e-4, atol=1e-4)), "mismatch vs reference"

    print("KERNEL_OK")
</pallas_src>

<mosaic_0001>
module attributes {stable_mosaic.version = 11 : i64} {
  func.func @_stats_kernel(%arg0: i32, %arg1: memref<8x256xf32, #tpu.memory_space<vmem>>, %arg2: memref<1x256xf32, #tpu.memory_space<vmem>>, %arg3: memref<1x8x128xf32, #tpu.memory_space<vmem>>) attributes {dimension_semantics = [#tpu.dimension_semantics<parallel>], iteration_bounds = array<i64: 1>, scalar_prefetch = 0 : i64, scratch_operands = 0 : i64, tpu.core_type = #tpu.core_type<tc>, window_params = [{transform_indices = @transform_0, window_bounds = array<i64: 8, 256>}, {pipeline_mode = #tpu.pipeline_mode<synchronous>, transform_indices = @transform_1, window_bounds = array<i64: 1, 256>}, {transform_indices = @transform_2, window_bounds = array<i64: 1, 8, 128>}]} {
    %c0 = arith.constant 0 : index
    %c0_0 = arith.constant 0 : index
    %0 = vector.load %arg1[%c0, %c0_0] : memref<8x256xf32, #tpu.memory_space<vmem>>, vector<8x256xf32>
    %c0_1 = arith.constant 0 : index
    %c0_2 = arith.constant 0 : index
    %1 = vector.load %arg2[%c0_1, %c0_2] : memref<1x256xf32, #tpu.memory_space<vmem>>, vector<1x256xf32>
    %2 = tpu.iota {dimensions = array<i32: 0>} : vector<8x256xi32>
    %c8_i32 = arith.constant 8 : i32
    %3 = arith.muli %arg0, %c8_i32 : i32
    %4 = vector.broadcast %3 : i32 to vector<8x256xi32>
    %5 = arith.addi %2, %4 : vector<8x256xi32>
    %c8_i32_3 = arith.constant 8 : i32
    %6 = vector.broadcast %c8_i32_3 : i32 to vector<8x256xi32>
    %7 = arith.cmpi slt, %5, %6 : vector<8x256xi32>
    %cst = arith.constant 0.000000e+00 : f32
    %8 = vector.broadcast %cst : f32 to vector<8x256xf32>
    %9 = arith.select %7, %0, %8 : vector<8x256xi1>, vector<8x256xf32>
    %10 = vector.broadcast %1 : vector<1x256xf32> to vector<8x256xf32>
    %11 = arith.mulf %9, %10 : vector<8x256xf32>
    %12 = vector.shape_cast %11 : vector<8x256xf32> to vector<1x8x256xf32>
    %cst_4 = arith.constant dense<0.000000e+00> : vector<1xf32>
    %13 = vector.multi_reduction <add>, %12, %cst_4 [1, 2] : vector<1x8x256xf32> to vector<1xf32>
    %14 = vector.shape_cast %13 : vector<1xf32> to vector<1x1x1xf32>
    %15 = vector.extract %14[0, 0, 0] : f32 from vector<1x1x1xf32>
    %cst_5 = arith.constant 0.000000e+00 : f32
    %16 = vector.broadcast %cst_5 : f32 to vector<8x256xf32>
    %17 = arith.cmpf one, %0, %16 : vector<8x256xf32>
    %18 = arith.andi %7, %17 : vector<8x256xi1>
    %cst_6 = arith.constant 0.000000e+00 : f32
    %19 = vector.shape_cast %1 : vector<1x256xf32> to vector<1x256xf32>
    %20 = vector.broadcast %19 : vector<1x256xf32> to vector<8x256xf32>
    %21 = vector.broadcast %cst_6 : f32 to vector<8x256xf32>
    %22 = arith.select %18, %20, %21 : vector<8x256xi1>, vector<8x256xf32>
    %23 = vector.shape_cast %22 : vector<8x256xf32> to vector<1x8x256xf32>
    %cst_7 = arith.constant dense<0.000000e+00> : vector<1xf32>
    %24 = vector.multi_reduction <add>, %23, %cst_7 [1, 2] : vector<1x8x256xf32> to vector<1xf32>
    %25 = vector.shape_cast %24 : vector<1xf32> to vector<1x1x1xf32>
    %26 = vector.extract %25[0, 0, 0] : f32 from vector<1x1x1xf32>
    %27 = tpu.iota {dimensions = array<i32: 2>} : vector<1x8x128xi32>
    %c0_i32 = arith.constant 0 : i32
    %28 = vector.broadcast %c0_i32 : i32 to vector<1x8x128xi32>
    %29 = arith.cmpi eq, %27, %28 : vector<1x8x128xi32>
    %cst_8 = arith.constant 0.000000e+00 : f32
    %30 = vector.broadcast %15 : f32 to vector<1x8x128xf32>
    %31 = vector.broadcast %cst_8 : f32 to vector<1x8x128xf32>
    %32 = arith.select %29, %30, %31 : vector<1x8x128xi1>, vector<1x8x128xf32>
    %c1_i32 = arith.constant 1 : i32
    %33 = vector.broadcast %c1_i32 : i32 to vector<1x8x128xi32>
    %34 = arith.cmpi eq, %27, %33 : vector<1x8x128xi32>
    %cst_9 = arith.constant 0.000000e+00 : f32
    %35 = vector.broadcast %26 : f32 to vector<1x8x128xf32>
    %36 = vector.broadcast %cst_9 : f32 to vector<1x8x128xf32>
    %37 = arith.select %34, %35, %36 : vector<1x8x128xi1>, vector<1x8x128xf32>
    %38 = arith.addf %32, %37 : vector<1x8x128xf32>
    %c0_10 = arith.constant 0 : index
    %c0_11 = arith.constant 0 : index
    %c0_12 = arith.constant 0 : index
    %39 = vector.load %arg3[%c0_10, %c0_11, %c0_12] : memref<1x8x128xf32, #tpu.memory_space<vmem>>, vector<1x8x128xf32>
    tpu.vector_store %arg3[%c0_10, %c0_11, %c0_12], %38 {strides = array<i32>} : memref<1x8x128xf32, #tpu.memory_space<vmem>>, vector<1x8x128xf32>,
    return
  }
  func.func @transform_0(%arg0: i32) -> (i32, i32) {
    %c0_i32 = arith.constant 0 : i32
    %c0_i32_0 = arith.constant 0 : i32
    return %arg0, %c0_i32 : i32, i32
  }
  func.func @transform_1(%arg0: i32) -> (i32, i32) {
    %c0_i32 = arith.constant 0 : i32
    %c0_i32_0 = arith.constant 0 : i32
    %c0_i32_1 = arith.constant 0 : i32
    return %c0_i32, %c0_i32_0 : i32, i32
  }
  func.func @transform_2(%arg0: i32) -> (i32, i32, i32) {
    %c0_i32 = arith.constant 0 : i32
    %c0_i32_0 = arith.constant 0 : i32
    %c0_i32_1 = arith.constant 0 : i32
    return %arg0, %c0_i32, %c0_i32_0 : i32, i32, i32
  }
}

</mosaic_0001>

<bundles_post_ra>
// kernel: tpu_custom_call.1
= control target key start
LH: loop header
LB: loop body
LE: loop exit
PB: predicated region body
PF: predicated region fallthrough
CT: control target
= control target key end

     0   :  { %7 = vsyncpa [#allocation3], 0  ;;  %s197_s0 = inlined_call_operand.hbm [shape: f32[8,256], index: 0, kind: input, shape index: {}]   ;;  %s198_s1 = inlined_call_operand.vmem [shape: f32[1,256], index: 1, kind: input, shape index: {}]   ;;  %s199_s2 = inlined_call_operand.hbm [shape: f32[1,8,128], index: 2, kind: output, shape index: {}]  }
   0x1   :  { %8 = vsyncpa [#allocation4], 0  ;;  %s153_s9 = smov [#allocation2]   ;;  %s105_s13 = scalar_lea.hbm %s197_s0, 256 }
   0x2   :  { %s15_s10 = sshll.u32 %s153_s9, 4  ;;  %p106_p0 = scmp.ne.s32.totalorder %s197_s0, %s105_s13  ;;  %s16_s10 = int_to_ptr.vmem [resolvable:$true] %s15_s10 }
   0x3   :  { %p109_p1 = scmp.lt.u32.totalorder %s105_s13, %s197_s0 }
   0x5   :  { %p111_p2 = pnand %p109_p1, %p106_p0 }
   0x7   :  { %114 = shalt.err (!%p111_p2)
}
   0x8   :  { %s115_s18 = scalar_lea.vmem %s16_s10, 256  ;;  %p120_p4 = scmp.lt.s32.totalorder %s16_s10, %s16_s10 }
   0x9   :  { %p116_p3 = scmp.ne.s32.totalorder %s16_s10, %s115_s18  ;;  %p121_p5 = scmp.lt.s32.totalorder %s115_s18, %s115_s18 }
   0xb   :  { %p122_p6 = por %p121_p5, %p120_p4 }
   0xd   :  { %p123_p7 = pnand %p122_p6, %p116_p3 }
   0xf   :  { %126 = shalt.err (!%p123_p7)
}
  0x10   :  { %18 = dma.hbm_to_vmem [thread:$0]  %s197_s0, 256, %s16_s10, [#allocation3]  }
  0x11   :  { %149 = dma.done.wait [#allocation3], 256  }
  0x12   :  { %150 = vsyncadd [#allocation3], 4294967040  ;;  %v36_v0 = vlaneseq  ;;  %v24_v4 = vld [vmem:[#allocation2] sm:$0xff]  ;;  %v25_v5 = vld [vmem:[#allocation2 + $0x8] sm:$0xff]  ;;  %s154_s23 = smov [#allocation5]  }
  0x13   :  { %v26_v6 = vld [vmem:[%s198_s1] sm:$0x3]  ;;  %vm58_vm0 = vcmp.ne.f32.partialorder %v24_v4, 0.0  ;;  %vm59_vm1 = vcmp.ne.f32.partialorder %v25_v5, 0.0  ;;  %s90_s24 = sshll.u32 %s154_s23, 4  ;;  %s91_s24 = int_to_ptr.vmem [resolvable:$true] %s90_s24 }
  0x14   :  { %v37_v1 = vshrl.u32 %v36_v0, 7  ;;  %v75_v29 = vand.u32 127, %v36_v0  ;;  %s127_s25 = scalar_lea.vmem %s91_s24, 128  ;;  %p132_p9 = scmp.lt.s32.totalorder %s91_s24, %s91_s24 }
  0x15   :  { %p128_p8 = scmp.ne.s32.totalorder %s91_s24, %s127_s25  ;;  %p133_p10 = scmp.lt.s32.totalorder %s127_s25, %s127_s25 }
  0x16   :  { %v38_v2 = vsub.s32 0, %v37_v1  ;;  %v42_v3 = vsub.s32 1, %v37_v1  ;;  %vm76_vm2 = vcmp.eq.s32.totalorder %v75_v29, 0  ;;  %vm79_vm3 = vcmp.eq.s32.totalorder %v75_v29, 1 }
  0x17   :  { %p134_p11 = por %p133_p10, %p132_p9 }
  0x18   :  { %v39_v7 = vrot.slane %v26_v6, %v38_v2  ;;  %v43_v8 = vrot.slane %v26_v6, %v42_v3 }
  0x19   :  { %p135_p12 = pnand %p134_p11, %p128_p8 }
  0x1a   :  { %v46_v9 = vmul.f32 %v39_v7, %v24_v4  ;;  %v47_v10 = vmul.f32 %v43_v8, %v25_v5  ;;  %v62_v11 = vsel %vm58_vm0, %v39_v7, 0.0  ;;  %v63_v12 = vsel %vm59_vm1, %v43_v8, 0.0 }
  0x1b   :  { %v64_v14 = vadd.f32 %v63_v12, %v62_v11 }
  0x1c   :  { %v48_v13 = vadd.f32 %v47_v10, %v46_v9 }
  0x1e   :  { %49 = vadd.xlane.f32.xlu0 %v48_v13 }
  0x22   :  { %65 = vadd.xlane.f32.xlu0 %v64_v14 }
  0xab   :  { %v50_v15 = vpop.xlane.xlu0 %49 }
  0xac   :  { %v51_v16 = vrot.slane %v50_v15, 4 }
  0xae   :  { %v52_v17 = vadd.f32 %v51_v16, %v50_v15 }
  0xaf   :  { %v66_v18 = vpop.xlane.xlu0 %65 }
  0xb0   :  { %v53_v19 = vrot.slane %v52_v17, 2  ;;  %v67_v20 = vrot.slane %v66_v18, 4 }
  0xb2   :  { %v68_v21 = vadd.f32 %v67_v20, %v66_v18  ;;  %v54_v22 = vadd.f32 %v53_v19, %v52_v17 }
  0xb4   :  { %v69_v23 = vrot.slane %v68_v21, 2  ;;  %v55_v24 = vrot.slane %v54_v22, 1 }
  0xb6   :  { %v70_v25 = vadd.f32 %v69_v23, %v68_v21  ;;  %v56_v26 = vadd.f32 %v55_v24, %v54_v22 }
  0xb8   :  { %99 = vpush %v56_v26  ;;  %v71_v27 = vrot.slane %v70_v25, 1 }
  0xba   :  { %v72_v28 = vadd.f32 %v71_v27, %v70_v25 }
  0xbc   :  { %101 = vpush %v72_v28 }
  0xe9   :  { %s100_s0 = spop %99 }
  0xea   :  { %v77_v30 = vstv %s100_s0 }
  0xeb   :  { %v78_v32 = vsel %vm76_vm2, %v77_v30, 0.0 }
  0xed   :  { %s102_s1 = spop %101 }
  0xee   :  { %v80_v31 = vstv %s102_s1 }
  0xef   :  { %v81_v33 = vsel %vm79_vm3, %v80_v31, 0.0 }
  0xf0   :  { %v82_v34 = vadd.f32 %v81_v33, %v78_v32 }
  0xf2   :  { %83 = vst [vmem:[#allocation5] sm:$0xff] %v82_v34 }
  0xf3   :  { %138 = shalt.err (!%p135_p12)
}
  0xf4   :  { %s139_s28 = scalar_lea.hbm %s199_s2, 128 }
  0xf5   :  { %p140_p13 = scmp.ne.s32.totalorder %s199_s2, %s139_s28  ;;  %p143_p0 = scmp.lt.u32.totalorder %s139_s28, %s199_s2 }
  0xf7   :  { %p145_p1 = pnand %p143_p0, %p140_p13 }
  0xf9   :  { %148 = shalt.err (!%p145_p1)
}
  0xfa   :  { %93 = dma.vmem_to_hbm [thread:$0]  %s91_s24, 128, %s199_s2, [#allocation4]  }
  0xfb   :  { %151 = dma.done.wait [#allocation4], 128  }
  0xfc   :  { %152 = vsyncadd [#allocation4], 4294967168 }
  0xfd   :  { %97 = vsyncpa [#allocation3], 1 }
  0xfe   :  { %98 = vsyncpa [#allocation4], 1 }

</bundles_post_ra>
